<compile_context>
chip_gen: v7x
topology: tpu7x:2x2x1
jax: 0.10.0
libtpu: 0.0.40
codegen_flags: <defaults>
</compile_context>

<pallas_src>
import functools

import jax
import jax.numpy as jnp
from jax.experimental import pallas as pl
from jax.experimental.pallas import tpu as pltpu


def ranknet_kernel(x_ref, w1_ref, b1_ref, w2_ref, b2_ref, w3_ref, b3_ref, o_ref,
                   *, dot_dtype):
    # x tile: (TB, 12), read straight from HBM as one contiguous chunk (no wrapper
    # transpose).  Dot operands are cast to `dot_dtype` (bf16 by default) with f32
    # accumulation; bias adds and tanh stay in f32 (v5e's VPU/EUP are f32-only).
    x = x_ref[...].astype(dot_dtype)                                   # (TB, 12)

    # Layer 1: contract the feature axis of both operands (w1 @ x.T) -> (16, TB).
    # This puts features on sublanes and batch on lanes, so everything downstream
    # (including the output store) is lane-dense.
    h = jax.lax.dot_general(
        w1_ref[...].astype(dot_dtype), x,
        dimension_numbers=(((1,), (1,)), ((), ())),
        preferred_element_type=jnp.float32)                            # (16, TB)
    h = jnp.tanh(h + b1_ref[...])

    # Layer 2: (16, 16) @ (16, TB) -> (16, TB).
    h = jnp.dot(w2_ref[...].astype(dot_dtype), h.astype(dot_dtype),
                preferred_element_type=jnp.float32)
    h = jnp.tanh(h + b2_ref[...])

    # Layer 3: (1, 16) @ (16, TB) -> (1, TB): lane-dense, unmasked store.
    out = jnp.dot(w3_ref[...].astype(dot_dtype), h.astype(dot_dtype),
                  preferred_element_type=jnp.float32)
    o_ref[...] = (out + b3_ref[...]).astype(o_ref.dtype)


def ranknet_forward(x, params, *, block_b=16384, dot_dtype=jnp.bfloat16):
    """x: (B, 12) float32.  Returns (B, 1) float32."""
    w1, b1, w2, b2, w3, b3 = params   # weights (out, in), biases (out, 1)
    B, F = x.shape

    # Batch tile: multiple of 128 lanes, capped at block_b.  No wrapper-side pad:
    # a ragged final tile relies on Pallas's partial-block handling (masked output
    # writes; garbage tail reads are harmless since batch columns are independent).
    block_b = max(128, (block_b // 128) * 128)
    TB = max(128, min(block_b, pl.cdiv(B, 128) * 128))
    grid = (pl.cdiv(B, TB),)
    # NOTE(v7x): for very large B keep block_b small enough that the grid has >= 2
    # tiles so the single "parallel" batch axis can feed both TensorCores.

    # VMEM budget: the (TB, 12) f32 input tile lane-pads 12->128 (TB*512 B/buffer,
    # double-buffered), plus (1, TB) out tiles (sublane-padded) and in-kernel temps.
    # Set the scoped limit explicitly (lifts v5e's 16 MiB default) but cap it well
    # under v7x's 64 MiB physical VMEM.
    vmem_limit = int(min(
        48 * 1024 * 1024,
        2 * TB * 128 * 4          # x double buffers (lane-padded 12 -> 128)
        + 2 * 8 * TB * 4          # out double buffers (sublane-padded 1 -> 8)
        + TB * 640                # in-kernel temporaries (bf16 x copy, h tiles)
        + (2 << 20),              # weights + fixed slack
    ))

    const = lambda i: (0, 0)      # weights/biases stay VMEM-resident across steps
    out = pl.pallas_call(
        functools.partial(ranknet_kernel, dot_dtype=dot_dtype),
        out_shape=jax.ShapeDtypeStruct((1, B), jnp.float32),
        grid=grid,
        in_specs=[
            pl.BlockSpec((TB, F), lambda i: (i, 0)),   # x: contiguous (TB, 12) tiles
            pl.BlockSpec((16, 12), const),             # w1
            pl.BlockSpec((16, 1), const),              # b1
            pl.BlockSpec((16, 16), const),             # w2
            pl.BlockSpec((16, 1), const),              # b2
            pl.BlockSpec((1, 16), const),              # w3
            pl.BlockSpec((1, 1), const),               # b3
        ],
        out_specs=pl.BlockSpec((1, TB), lambda i: (0, i)),
        compiler_params=pltpu.CompilerParams(
            dimension_semantics=("parallel",),
            vmem_limit_bytes=vmem_limit,
        ),
    )(x, w1, b1, w2, b2, w3, b3)

    # (1, B) -> (B, 1): same row-major layout, so a reshape (free), not a transpose.
    return out.reshape(B, 1)


def init_params(key):
    # Deterministic init mimicking PyTorch nn.Linear default (uniform +/- 1/sqrt(fan_in)).
    # Weights stored in PyTorch layout (out_features, in_features); biases as (out, 1).
    def linear_init(k, fan_in, fan_out):
        kw, kb = jax.random.split(k)
        bound = 1.0 / jnp.sqrt(fan_in)
        w = jax.random.uniform(kw, (fan_out, fan_in), jnp.float32, -bound, bound)
        b = jax.random.uniform(kb, (fan_out, 1), jnp.float32, -bound, bound)
        return w, b

    k1, k2, k3 = jax.random.split(key, 3)
    w1, b1 = linear_init(k1, 12, 16)
    w2, b2 = linear_init(k2, 16, 16)
    w3, b3 = linear_init(k3, 16, 1)
    return w1, b1, w2, b2, w3, b3


def reference_forward(x, params):
    w1, b1, w2, b2, w3, b3 = params
    h = jnp.tanh(x @ w1.T + b1.T)
    h = jnp.tanh(h @ w2.T + b2.T)
    return h @ w3.T + b3.T


if __name__ == "__main__":
    key = jax.random.PRNGKey(0)
    pkey, xkey = jax.random.split(key)
    params = init_params(pkey)

    # --- Small single-tile batch (block larger than the array; masked tail). ---
    B = 8
    x = jax.random.normal(xkey, (B, 12), jnp.float32)
    ref = reference_forward(x, params)

    # Default bf16-dot path (f32 accumulation): looser tolerance vs f32 reference.
    out = jax.block_until_ready(ranknet_forward(x, params))
    assert out.shape == (B, 1)
    assert jnp.allclose(out, ref, atol=5e-2, rtol=5e-2), "bf16-dot path mismatch"

    # f32-dot path: tight tolerance vs f32 reference.
    out_f32 = jax.block_until_ready(ranknet_forward(x, params, dot_dtype=jnp.float32))
    assert jnp.allclose(out_f32, ref, atol=1e-5, rtol=1e-5), "f32-dot path mismatch"

    # --- Multi-tile + ragged tail (B % TB != 0) with a small tile to exercise the
    #     index_map and partial-final-block path without a huge test batch. ---
    xm = jax.random.normal(jax.random.PRNGKey(1), (300, 12), jnp.float32)
    refm = reference_forward(xm, params)
    outm = jax.block_until_ready(ranknet_forward(xm, params, block_b=128))
    assert outm.shape == (300, 1)
    assert jnp.allclose(outm, refm, atol=5e-2, rtol=5e-2), "multi-tile path mismatch"

    print("KERNEL_OK")
</pallas_src>

<mosaic_0001>
module attributes {stable_mosaic.version = 11 : i64} {
  func.func @ranknet_kernel(%arg0: i32, %arg1: memref<128x12xf32, #tpu.memory_space<vmem>>, %arg2: memref<16x12xf32, #tpu.memory_space<vmem>>, %arg3: memref<16x1xf32, #tpu.memory_space<vmem>>, %arg4: memref<16x16xf32, #tpu.memory_space<vmem>>, %arg5: memref<16x1xf32, #tpu.memory_space<vmem>>, %arg6: memref<1x16xf32, #tpu.memory_space<vmem>>, %arg7: memref<1x1xf32, #tpu.memory_space<vmem>>, %arg8: memref<1x128xf32, #tpu.memory_space<vmem>>) attributes {dimension_semantics = [#tpu.dimension_semantics<parallel>], iteration_bounds = array<i64: 1>, scalar_prefetch = 0 : i64, scratch_operands = 0 : i64, tpu.core_type = #tpu.core_type<tc>, window_params = [{transform_indices = @transform_0, window_bounds = array<i64: 128, 12>}, {pipeline_mode = #tpu.pipeline_mode<synchronous>, transform_indices = @transform_1, window_bounds = array<i64: 16, 12>}, {pipeline_mode = #tpu.pipeline_mode<synchronous>, transform_indices = @transform_2, window_bounds = array<i64: 16, 1>}, {pipeline_mode = #tpu.pipeline_mode<synchronous>, transform_indices = @transform_3, window_bounds = array<i64: 16, 16>}, {pipeline_mode = #tpu.pipeline_mode<synchronous>, transform_indices = @transform_4, window_bounds = array<i64: 16, 1>}, {pipeline_mode = #tpu.pipeline_mode<synchronous>, transform_indices = @transform_5, window_bounds = array<i64: 1, 16>}, {pipeline_mode = #tpu.pipeline_mode<synchronous>, transform_indices = @transform_6, window_bounds = array<i64: 1, 1>}, {transform_indices = @transform_7, window_bounds = array<i64: 1, 128>}]} {
    %c0 = arith.constant 0 : index
    %c0_0 = arith.constant 0 : index
    %0 = vector.load %arg1[%c0, %c0_0] : memref<128x12xf32, #tpu.memory_space<vmem>>, vector<128x12xf32>
    %1 = arith.truncf %0 : vector<128x12xf32> to vector<128x12xbf16>
    %c0_1 = arith.constant 0 : index
    %c0_2 = arith.constant 0 : index
    %2 = vector.load %arg2[%c0_1, %c0_2] : memref<16x12xf32, #tpu.memory_space<vmem>>, vector<16x12xf32>
    %3 = arith.truncf %2 : vector<16x12xf32> to vector<16x12xbf16>
    %cst = arith.constant dense<0.000000e+00> : vector<16x128xf32>
    %4 = tpu.matmul %3, %1, %cst {dimension_numbers = #tpu.dot_dimension_numbers<[1], [1], [0], [0], [0, 0, 1, 0], [], []>} : vector<16x12xbf16>, vector<128x12xbf16>, vector<16x128xf32> -> vector<16x128xf32>
    %c0_3 = arith.constant 0 : index
    %c0_4 = arith.constant 0 : index
    %5 = vector.load %arg3[%c0_3, %c0_4] : memref<16x1xf32, #tpu.memory_space<vmem>>, vector<16x1xf32>
    %6 = vector.broadcast %5 : vector<16x1xf32> to vector<16x128xf32>
    %7 = arith.addf %4, %6 : vector<16x128xf32>
    %8 = math.tanh %7 : vector<16x128xf32>
    %c0_5 = arith.constant 0 : index
    %c0_6 = arith.constant 0 : index
    %9 = vector.load %arg4[%c0_5, %c0_6] : memref<16x16xf32, #tpu.memory_space<vmem>>, vector<16x16xf32>
    %10 = arith.truncf %9 : vector<16x16xf32> to vector<16x16xbf16>
    %11 = arith.truncf %8 : vector<16x128xf32> to vector<16x128xbf16>
    %cst_7 = arith.constant dense<0.000000e+00> : vector<16x128xf32>
    %12 = tpu.matmul %10, %11, %cst_7 {dimension_numbers = #tpu.dot_dimension_numbers<[1], [0], [0], [1], [0, 0, 1, 1], [], []>} : vector<16x16xbf16>, vector<16x128xbf16>, vector<16x128xf32> -> vector<16x128xf32>
    %c0_8 = arith.constant 0 : index
    %c0_9 = arith.constant 0 : index
    %13 = vector.load %arg5[%c0_8, %c0_9] : memref<16x1xf32, #tpu.memory_space<vmem>>, vector<16x1xf32>
    %14 = vector.broadcast %13 : vector<16x1xf32> to vector<16x128xf32>
    %15 = arith.addf %12, %14 : vector<16x128xf32>
    %16 = math.tanh %15 : vector<16x128xf32>
    %c0_10 = arith.constant 0 : index
    %c0_11 = arith.constant 0 : index
    %17 = vector.load %arg6[%c0_10, %c0_11] : memref<1x16xf32, #tpu.memory_space<vmem>>, vector<1x16xf32>
    %18 = arith.truncf %17 : vector<1x16xf32> to vector<1x16xbf16>
    %19 = arith.truncf %16 : vector<16x128xf32> to vector<16x128xbf16>
    %cst_12 = arith.constant dense<0.000000e+00> : vector<1x128xf32>
    %20 = tpu.matmul %18, %19, %cst_12 {dimension_numbers = #tpu.dot_dimension_numbers<[1], [0], [0], [1], [0, 0, 1, 1], [], []>} : vector<1x16xbf16>, vector<16x128xbf16>, vector<1x128xf32> -> vector<1x128xf32>
    %c0_13 = arith.constant 0 : index
    %c0_14 = arith.constant 0 : index
    %21 = vector.load %arg7[%c0_13, %c0_14] : memref<1x1xf32, #tpu.memory_space<vmem>>, vector<1x1xf32>
    %22 = vector.broadcast %21 : vector<1x1xf32> to vector<1x128xf32>
    %23 = arith.addf %20, %22 : vector<1x128xf32>
    %c0_15 = arith.constant 0 : index
    %c0_16 = arith.constant 0 : index
    %24 = vector.load %arg8[%c0_15, %c0_16] : memref<1x128xf32, #tpu.memory_space<vmem>>, vector<1x128xf32>
    tpu.vector_store %arg8[%c0_15, %c0_16], %23 {strides = array<i32>} : memref<1x128xf32, #tpu.memory_space<vmem>>, vector<1x128xf32>,
    return
  }
  func.func @transform_0(%arg0: i32) -> (i32, i32) {
    %c0_i32 = arith.constant 0 : i32
    %c0_i32_0 = arith.constant 0 : i32
    return %arg0, %c0_i32 : i32, i32
  }
  func.func @transform_1(%arg0: i32) -> (i32, i32) {
    %c0_i32 = arith.constant 0 : i32
    %c0_i32_0 = arith.constant 0 : i32
    %c0_i32_1 = arith.constant 0 : i32
    return %c0_i32, %c0_i32_0 : i32, i32
  }
  func.func @transform_2(%arg0: i32) -> (i32, i32) {
    %c0_i32 = arith.constant 0 : i32
    %c0_i32_0 = arith.constant 0 : i32
    %c0_i32_1 = arith.constant 0 : i32
    return %c0_i32, %c0_i32_0 : i32, i32
  }
  func.func @transform_3(%arg0: i32) -> (i32, i32) {
    %c0_i32 = arith.constant 0 : i32
    %c0_i32_0 = arith.constant 0 : i32
    %c0_i32_1 = arith.constant 0 : i32
    return %c0_i32, %c0_i32_0 : i32, i32
  }
  func.func @transform_4(%arg0: i32) -> (i32, i32) {
    %c0_i32 = arith.constant 0 : i32
    %c0_i32_0 = arith.constant 0 : i32
    %c0_i32_1 = arith.constant 0 : i32
    return %c0_i32, %c0_i32_0 : i32, i32
  }
  func.func @transform_5(%arg0: i32) -> (i32, i32) {
    %c0_i32 = arith.constant 0 : i32
    %c0_i32_0 = arith.constant 0 : i32
    %c0_i32_1 = arith.constant 0 : i32
    return %c0_i32, %c0_i32_0 : i32, i32
  }
  func.func @transform_6(%arg0: i32) -> (i32, i32) {
    %c0_i32 = arith.constant 0 : i32
    %c0_i32_0 = arith.constant 0 : i32
    %c0_i32_1 = arith.constant 0 : i32
    return %c0_i32, %c0_i32_0 : i32, i32
  }
  func.func @transform_7(%arg0: i32) -> (i32, i32) {
    %c0_i32 = arith.constant 0 : i32
    %c0_i32_0 = arith.constant 0 : i32
    return %c0_i32, %arg0 : i32, i32
  }
}

</mosaic_0001>

<bundles_post_ra>
// kernel: tpu_custom_call.1
= control target key start
LH: loop header
LB: loop body
LE: loop exit
PB: predicated region body
PF: predicated region fallthrough
CT: control target
= control target key end

     0   :  { %s530_s0 = inlined_call_operand.hbm [shape: f32[8,12], index: 0, kind: input, shape index: {}]   ;;  %s531_s1 = inlined_call_operand.vmem [shape: f32[16,12], index: 1, kind: input, shape index: {}]   ;;  %s532_s2 = inlined_call_operand.vmem [shape: f32[16,1], index: 2, kind: input, shape index: {}]   ;;  %s533_s3 = inlined_call_operand.vmem [shape: f32[16,16], index: 3, kind: input, shape index: {}]   ;;  %s534_s4 = inlined_call_operand.vmem [shape: f32[16,1], index: 4, kind: input, shape index: {}]   ;;  %s535_s5 = inlined_call_operand.vmem [shape: f32[1,16], index: 5, kind: input, shape index: {}]   ;;  %s536_s6 = inlined_call_operand.<no memory space> [shape: f32[1,1], index: 6, kind: input, shape index: {}]   ;;  %s537_s7 = inlined_call_operand.hbm [shape: f32[1,8], index: 7, kind: output, shape index: {}]  }
   0x1   :  { %v12_v0 = vstv %s536_s6 }
   0x2   :  { %13 = vst [vmem:[#allocation2] sm:$0x1] %v12_v0 }
   0x3   :  { %14 = vsyncpa [#allocation4], 0 }
   0x4   :  { %15 = vsyncpa [#allocation5], 0 }
   0x5   :  { %20 = vsyncadd [#allocation4], 1920  ;;  %s402_s26 = smov [#allocation3]   ;;  %s354_s30 = scalar_lea.hbm %s530_s0, 128 }
   0x6   :  { %s21_s27 = sshll.u32 %s402_s26, 4  ;;  %p355_p0 = scmp.ne.s32.totalorder %s530_s0, %s354_s30  ;;  %s22_s27 = int_to_ptr.vmem [resolvable:$true] %s21_s27 }
   0x7   :  { %p358_p1 = scmp.lt.u32.totalorder %s354_s30, %s530_s0 }
   0x9   :  { %p360_p2 = pnand %p358_p1, %p355_p0 }
   0xb   :  { %363 = shalt.err (!%p360_p2)
}
   0xc   :  { %s364_s6 = scalar_lea.vmem %s22_s27, 128  ;;  %s368_s12 = scalar_lea.vmem %s22_s27, 2048 }
   0xd   :  { %p365_p3 = scmp.ne.s32.totalorder %s22_s27, %s364_s6  ;;  %p369_p4 = scmp.lt.s32.totalorder %s22_s27, %s22_s27 }
   0xe   :  { %p370_p5 = scmp.lt.s32.totalorder %s368_s12, %s364_s6 }
  0x10   :  { %p371_p6 = por %p370_p5, %p369_p4 }
  0x12   :  { %p372_p7 = pnand %p371_p6, %p365_p3 }
  0x14   :  { %375 = shalt.err (!%p372_p7)
}
  0x15   :  { %s403_s13 = smov 128   ;;  %s404_s14 = smov 8  }
  0x16   :  { %27 = dma.hbm_to_vmem [thread:$0]  %s530_s0, 128, %s22_s27, [#allocation4], %s403_s13, %s403_s13, %s404_s14  }
  0x17   :  { %398 = dma.done.wait [#allocation4], 2048  }
  0x18   :  { %399 = vsyncadd [#allocation4], 4294965248  ;;  %v405_v1 = vmov 0.0   ;;  %vm406_vm0 = vmmov 0   ;;  %v407_v2 = vmov 0   ;;  %v44_v3 = vld [vmem:[#allocation3] sm:$0xff] }
  0x19   :  { %305 = vmatprep.subr.bf16.mxu0 %v405_v1  ;;  %321 = vmatprep.mubr.msk.bf16.mxu0 %vm406_vm0, %v405_v1  ;;  %v45_v4 = vld [vmem:[#allocation3 + $0x8] sm:$0xff]  ;;  %vm83_vm1 = vcmask 97280   ;;  %v46_v6 = vld [vmem:[#allocation3 + $0x10] sm:$0xff]  ;;  %v47_v7 = vld [vmem:[#allocation3 + $0x18] sm:$0xff]  ;;  %vm170_vm2 = vcmask 130048   ;;  %s408_s30 = smov [#allocation6]  }
  0x1a   :  { %344 = vset.pattern.permute.xlu0 %v407_v2  ;;  %325 = vmatprep.subr.bf16.mxu1 %v405_v1  ;;  %v60_v5 = vpack.c.bf16 %v45_v4, %v44_v3  ;;  %v61_v9 = vpack.c.bf16 %v47_v7, %v46_v6  ;;  %v71_v10 = vld [vmem:[%s532_s2] sm:$0xff]  ;;  %v72_v11 = vld [vmem:[%s532_s2 + $0x8] sm:$0xff]  ;;  %v50_v18 = vld [vmem:[#allocation3 + $0x30] sm:$0xff]  ;;  %s280_s8 = sshll.u32 %s408_s30, 4  ;;  %s281_s8 = int_to_ptr.vmem [resolvable:$true] %s280_s8 }
  0x1b   :  { %327 = vmatprep.mubr.msk.bf16.mxu1 %vm406_vm0, %v405_v1  ;;  %345 = vset.pattern.permute.xlu1 %v407_v2  ;;  %v48_v13 = vld [vmem:[#allocation3 + $0x20] sm:$0xff]  ;;  %v49_v14 = vld [vmem:[#allocation3 + $0x28] sm:$0xff]  ;;  %v220_v15 = vld [vmem:[#allocation2] sm:$0x1]  ;;  %s380_s9 = scalar_lea.vmem %s281_s8, 32  ;;  %p381_p9 = scmp.lt.s32.totalorder %s281_s8, %s281_s8 }
  0x1c   :  { %v88_v8 = vsel %vm83_vm1, %v60_v5, 0  ;;  %75 = vperm.xlu0 %344, %v71_v10   ;;  %v91_v12 = vsel %vm83_vm1, %v61_v9, 0  ;;  %v62_v16 = vpack.c.bf16 %v49_v14, %v48_v13  ;;  %v51_v19 = vld [vmem:[#allocation3 + $0x38] sm:$0xff]  ;;  %v52_v22 = vld [vmem:[#allocation3 + $0x40] sm:$0xff]  ;;  %v53_v23 = vld [vmem:[#allocation3 + $0x48] sm:$0xff] }
  0x1d   :  { %306 = vmatpush3.bf16.xpose.msra.mxu0 %v88_v8  ;;  %v63_v20 = vpack.c.bf16 %v51_v19, %v50_v18  ;;  %v64_v24 = vpack.c.bf16 %v53_v23, %v52_v22  ;;  %v54_v26 = vld [vmem:[#allocation3 + $0x50] sm:$0xff]  ;;  %v55_v27 = vld [vmem:[#allocation3 + $0x58] sm:$0xff]  ;;  %v56_v30 = vld [vmem:[#allocation3 + $0x60] sm:$0xff] }
  0x1e   :  { %307 = vmatprep.subr.bf16.mxu0 %v405_v1  ;;  %v94_v17 = vsel %vm83_vm1, %v62_v16, 0  ;;  %v65_v28 = vpack.c.bf16 %v55_v27, %v54_v26  ;;  %v57_v31 = vld [vmem:[#allocation3 + $0x68] sm:$0xff]  ;;  %v58_v34 = vld [vmem:[#allocation3 + $0x70] sm:$0xff]  ;;  %v59_v35 = vld [vmem:[#allocation3 + $0x78] sm:$0xff] }
  0x1f   :  { %v97_v21 = vsel %vm83_vm1, %v63_v20, 0  ;;  %v100_v25 = vsel %vm83_vm1, %v64_v24, 0  ;;  %v66_v32 = vpack.c.bf16 %v57_v31, %v56_v30  ;;  %v67_v36 = vpack.c.bf16 %v59_v35, %v58_v34  ;;  %v68_v38 = vld [vmem:[%s531_s1] sm:$0xff]  ;;  %v69_v39 = vld [vmem:[%s531_s1 + $0x8] sm:$0xff] }
  0x20   :  { %80 = vperm.xlu0 %344, %v72_v11   ;;  %v103_v29 = vsel %vm83_vm1, %v65_v28, 0  ;;  %v70_v40 = vpack.c.bf16 %v69_v39, %v68_v38  ;;  %v158_v41 = vld [vmem:[%s534_s4] sm:$0xff]  ;;  %v159_v42 = vld [vmem:[%s534_s4 + $0x8] sm:$0xff] }
  0x21   :  { %v106_v33 = vsel %vm83_vm1, %v66_v32, 0  ;;  %v109_v37 = vsel %vm83_vm1, %v67_v36, 0  ;;  %162 = vperm.xlu1 %345, %v158_v41   ;;  %v154_v52 = vld [vmem:[%s533_s3] sm:$0xff]  ;;  %v155_v53 = vld [vmem:[%s533_s3 + $0x8] sm:$0xff] }
  0x22   :  { %v156_v56 = vpack.c.bf16 %v155_v53, %v154_v52  ;;  %v217_v3 = vld [vmem:[%s535_s5] sm:$0x1]  ;;  %s376_s5 = scalar_lea.vmem %s281_s8, 16 }
  0x23   :  { %v218_v6 = vpack.c.bf16 %v217_v3, %v217_v3  ;;  %p377_p8 = scmp.ne.s32.totalorder %s281_s8, %s376_s5  ;;  %p382_p10 = scmp.lt.s32.totalorder %s380_s9, %s376_s5 }
  0x24   :  { %223 = vperm.xlu0 %344, %v220_v15  }
  0x25   :  { %308 = vmatpush3.bf16.xpose.msra.mxu0 %v91_v12  ;;  %167 = vperm.xlu1 %345, %v159_v42   ;;  %p383_p11 = por %p382_p10, %p381_p9 }
  0x26   :  { %309 = vmatprep.subr.bf16.mxu0 %v405_v1 }
  0x27   :  { %p384_p12 = pnand %p383_p11, %p377_p8 }
  0x2d   :  { %310 = vmatpush3.bf16.xpose.msra.mxu0 %v94_v17 }
  0x2e   :  { %311 = vmatprep.subr.bf16.mxu0 %v405_v1 }
  0x35   :  { %312 = vmatpush3.bf16.xpose.msra.mxu0 %v97_v21 }
  0x36   :  { %313 = vmatprep.subr.bf16.mxu0 %v405_v1 }
  0x3d   :  { %314 = vmatpush3.bf16.xpose.msra.mxu0 %v100_v25 }
  0x3e   :  { %315 = vmatprep.subr.bf16.mxu0 %v405_v1 }
  0x45   :  { %316 = vmatpush3.bf16.xpose.msra.mxu0 %v103_v29 }
  0x46   :  { %317 = vmatprep.subr.bf16.mxu0 %v405_v1 }
  0x4d   :  { %318 = vmatpush3.bf16.xpose.msra.mxu0 %v106_v33 }
  0x4e   :  { %319 = vmatprep.subr.bf16.mxu0 %v405_v1 }
  0x55   :  { %320 = vmatpush3.bf16.xpose.msra.mxu0 %v109_v37 }
  0x5c   :  { %322 = vmatmul.mubr.msk.bf16.vlgmr.msra.gmra.mrb[0].mxu0 %vm83_vm1, %v70_v40 }
  0x9b   :  { %v76_v43 = vpop.permute.xlu0 %75 }
  0x9f   :  { %v81_v47 = vpop.permute.xlu0 %80 }
  0xa0   :  { %v163_v57 = vpop.permute.xlu1 %162 }
  0xa3   :  { %v224_v9 = vpop.permute.xlu0 %223 }
  0xa4   :  { %v168_v61 = vpop.permute.xlu1 %167 }
 0x12f   :  { %v145_v44 = vpop.f32.mrb[0].mxu0 }
 0x130   :  { %v146_v45 = vadd.f32 %v145_v44, %v76_v43  ;;  %v323_v46 = vpop.f32.mrb[1].mxu0 }
 0x131   :  { %v148_v48 = vpop.f32.mrb[2].mxu0 }
 0x132   :  { %v149_v49 = vadd.f32 %v148_v48, %v81_v47  ;;  %v324_v50 = vpop.f32.mrb[3].mxu0  ;;  %346 = vtanh.f32 %v146_v45 }
 0x134   :  { %348 = vtanh.f32 %v149_v49 }
 0x13c   :  { %v347_v51 = vpop.eup %346 }
 0x13e   :  { %v349_v54 = vpop.eup %348 }
 0x13f   :  { %v157_v55 = vpack.c.bf16 %v349_v54, %v347_v51 }
 0x141   :  { %326 = vmatpush3.bf16.msra.mxu1 %v157_v55 }
 0x142   :  { %331 = vmatprep.subr.bf16.mxu1 %v405_v1 }
 0x144   :  { %328 = vmatmul.mubr.msk.bf16.vlgmr.msra.gmra.mrb[0].mxu1 %vm170_vm2, %v156_v56 }
 0x145   :  { %333 = vmatprep.mubr.msk.bf16.mxu1 %vm406_vm0, %v405_v1  ;;  %v226_v1 = vlaneseq }
 0x147   :  { %v227_v7 = vshrl.u32 %v226_v1, 7 }
 0x149   :  { %v228_v8 = vsub.s32 0, %v227_v7 }
 0x14b   :  { %v229_v10 = vrot.slane %v224_v9, %v228_v8 }
 0x217   :  { %v208_v58 = vpop.f32.mrb[0].mxu1 }
 0x218   :  { %v209_v59 = vadd.f32 %v208_v58, %v163_v57  ;;  %v329_v60 = vpop.f32.mrb[1].mxu1 }
 0x219   :  { %v211_v62 = vpop.f32.mrb[2].mxu1 }
 0x21a   :  { %v212_v63 = vadd.f32 %v211_v62, %v168_v61  ;;  %v330_v0 = vpop.f32.mrb[3].mxu1  ;;  %350 = vtanh.f32 %v209_v59 }
 0x21c   :  { %352 = vtanh.f32 %v212_v63 }
 0x224   :  { %v351_v2 = vpop.eup %350 }
 0x226   :  { %v353_v4 = vpop.eup %352 }
 0x227   :  { %v219_v5 = vpack.c.bf16 %v353_v4, %v351_v2 }
 0x229   :  { %332 = vmatpush3.bf16.msra.mxu1 %v219_v5 }
 0x22c   :  { %334 = vmatmul.mubr.msk.bf16.vlgmr.msra.gmra.mrb[4].mxu1 %vm170_vm2, %v218_v6 }
 0x2ff   :  { %v267_v11 = vpop.f32.mrb[4].mxu1 }
 0x300   :  { %v268_v12 = vadd.f32 %v267_v11, %v229_v10  ;;  %v335_v13 = vpop.f32.mrb[5].mxu1 }
 0x301   :  { %v270_v14 = vpop.f32.mrb[6].mxu1 }
 0x302   :  { %273 = vst [vmem:[#allocation6] sm:$0x1] %v268_v12  ;;  %v336_v15 = vpop.f32.mrb[7].mxu1 }
 0x303   :  { %387 = shalt.err (!%p384_p12)
}
 0x304   :  { %s388_s6 = scalar_lea.hbm %s537_s7, 16 }
 0x305   :  { %p389_p13 = scmp.ne.s32.totalorder %s537_s7, %s388_s6  ;;  %p392_p0 = scmp.lt.u32.totalorder %s388_s6, %s537_s7 }
 0x307   :  { %p394_p1 = pnand %p392_p0, %p389_p13 }
 0x309   :  { %397 = shalt.err (!%p394_p1)
}
 0x30a   :  { %283 = dma.vmem_to_hbm [thread:$0]  %s281_s8, 16, %s537_s7, [#allocation5]  }
 0x30b   :  { %400 = dma.done.wait [#allocation5], 16  }
 0x30c   :  { %401 = vsyncadd [#allocation5], 4294967280 }
 0x30d   :  { %287 = vsyncpa [#allocation4], 1 }
 0x30e   :  { %288 = vsyncpa [#allocation5], 1 }

</bundles_post_ra>
